<compile_context>
chip_gen: v7x
topology: tpu7x:2x2x1
jax: 0.10.0
libtpu: 0.0.40
codegen_flags: <defaults>
</compile_context>

<pallas_src>
import functools

import jax
import jax.numpy as jnp
from jax.experimental import pallas as pl
from jax.experimental.pallas import tpu as pltpu

# Fixed Gaussian weights from the module __init__ (requires_grad=False).
GAUSS = (
    (0.03797616, 0.044863533, 0.03797616),
    (0.044863533, 0.053, 0.044863533),
    (0.03797616, 0.044863533, 0.03797616),
)

# Separable 1D taps: outer(g1d, g1d) reproduces GAUSS to ~3e-8 per tap.
_G_EDGE = GAUSS[0][0] ** 0.5   # ~0.19487473
_G_MID = GAUSS[1][1] ** 0.5    # ~0.23021729


def _gauss_convt_kernel(x_ref, o_ref, xp_ref, *, h, w):
    """x_ref: (TB,H,W); o_ref: (TB,H+2,W+2); xp_ref: (TB,H+4,W+4) f32 scratch."""
    ho, wo = h + 2, w + 2
    tb = xp_ref.shape[0]
    a = jnp.float32(_G_EDGE)
    b = jnp.float32(_G_MID)

    # Build the 2-pixel zero halo with '=' stores only (no RMW, no full
    # re-zero): four small border stores + one block-sized interior store.
    # Re-zeroing the borders every step keeps the kernel correct under
    # megacore grid sharding (each core has its own scratch).
    xp_ref[:, 0:2, :] = jnp.zeros((tb, 2, w + 4), jnp.float32)
    xp_ref[:, h + 2:h + 4, :] = jnp.zeros((tb, 2, w + 4), jnp.float32)
    xp_ref[:, 2:h + 2, 0:2] = jnp.zeros((tb, h, 2), jnp.float32)
    xp_ref[:, 2:h + 2, w + 2:w + 4] = jnp.zeros((tb, h, 2), jnp.float32)
    xp_ref[:, 2:h + 2, 2:w + 2] = x_ref[...].astype(jnp.float32)

    # Single load of the padded block; separable transposed conv in registers.
    xp = xp_ref[...]                                             # (TB, H+4, W+4)
    # Vertical (sublane) 3-tap pass.
    v = a * (xp[:, 0:ho, :] + xp[:, 2:ho + 2, :]) + b * xp[:, 1:ho + 1, :]
    # Horizontal (lane) 3-tap pass; single store to the output block.
    out = a * (v[:, :, 0:wo] + v[:, :, 2:wo + 2]) + b * v[:, :, 1:wo + 1]
    o_ref[...] = out.astype(o_ref.dtype)


def _round_up(x, m):
    return (x + m - 1) // m * m


def _vmem_bytes_per_sample(h, w, dtype):
    """Conservative VMEM bytes per batch sample: double-buffered in/out blocks
    rounded up to the (sublane, 128) tile, plus the f32 padded scratch and an
    allowance for compiler-materialized vector temporaries."""
    itemsize = jnp.dtype(dtype).itemsize
    sub = max(8, 32 // itemsize)          # 8 for f32, 16 for bf16
    in_blk = _round_up(h, sub) * _round_up(w, 128) * itemsize * 2
    out_blk = _round_up(h + 2, sub) * _round_up(w + 2, 128) * itemsize * 2
    pad_f32 = _round_up(h + 4, 8) * _round_up(w + 4, 128) * 4
    scratch = pad_f32                      # single-buffered
    temps = 3 * pad_f32                    # xp/v/out register values spill to VMEM
    return in_blk + out_blk + scratch + temps


def _tpu_vmem_and_cores():
    """(VMEM capacity bytes, has >= 2 TensorCores).  Robust fallbacks."""
    vmem = 64 << 20                        # safe minimum across v5e/v6e/v7x
    multi_tc = False
    try:
        vmem = int(pltpu.get_tpu_info().vmem_capacity_bytes)
    except Exception:
        pass
    try:
        kind = jax.devices()[0].device_kind.lower()
        multi_tc = any(t in kind for t in ("v7", "7x", "v4", "v5p"))
    except Exception:
        pass
    return vmem, multi_tc


def _pick_block_n(n, h, w, dtype):
    """Samples per grid step (TB) and a matching vmem_limit_bytes.

    TB is as large as the generation-aware VMEM budget allows (big DMAs, few
    ~0.35us grid steps); >= 2 grid entries are kept only on 2-TC parts so the
    'parallel' axis can be megacore-sharded.  TB need not divide N."""
    vmem_cap, multi_tc = _tpu_vmem_and_cores()
    budget = (40 << 20) if vmem_cap >= (100 << 20) else (20 << 20)
    budget = min(budget, max(4 << 20, vmem_cap - (8 << 20)))

    per_sample = _vmem_bytes_per_sample(h, w, dtype)
    cap = max(1, budget // per_sample)
    if multi_tc and n >= 2:
        cap = min(cap, max(1, n // 2))     # both TensorCores get work
    tb = int(min(cap, n))

    est = tb * per_sample + (1 << 20)
    vmem_limit = int(min(vmem_cap, max(32 << 20, est + (16 << 20))))
    return tb, vmem_limit


def gauss_conv2d(x):
    """x: (N, 1, H, W) float (NCHW). Returns conv_transpose2d(x, GAUSS):
    shape (N, 1, H+2, W+2)."""
    n, c, h, w = x.shape
    assert c == 1, "GaussConv2d weight is (1,1,3,3): single in/out channel"
    ho, wo = h + 2, w + 2

    tb, vmem_limit = _pick_block_n(n, h, w, x.dtype)
    grid = (pl.cdiv(n, tb),)               # tail block clamped/masked by Pallas

    itemsize = jnp.dtype(x.dtype).itemsize
    x3 = x.reshape(n, h, w)                # free reshape: drop the C==1 axis

    out = pl.pallas_call(
        functools.partial(_gauss_convt_kernel, h=h, w=w),
        out_shape=jax.ShapeDtypeStruct((n, ho, wo), x.dtype),
        grid=grid,
        in_specs=[pl.BlockSpec((tb, h, w), lambda i: (i, 0, 0))],
        out_specs=pl.BlockSpec((tb, ho, wo), lambda i: (i, 0, 0)),
        scratch_shapes=[pltpu.VMEM((tb, h + 4, w + 4), jnp.float32)],
        compiler_params=pltpu.CompilerParams(
            dimension_semantics=("parallel",),
            vmem_limit_bytes=vmem_limit),
        cost_estimate=pl.CostEstimate(
            flops=int(8 * n * ho * wo),
            transcendentals=0,
            bytes_accessed=int(itemsize * n * (h * w + ho * wo))),
    )(x3)
    return out.reshape(n, 1, ho, wo)


def _reference(x):
    """Pure-JAX reference of conv_transpose2d with the exact 2D GAUSS weight."""
    n, c, h, w = x.shape
    xp = jnp.pad(x, ((0, 0), (0, 0), (2, 2), (2, 2)))
    out = jnp.zeros((n, 1, h + 2, w + 2), jnp.float32)
    for a in range(3):
        for b in range(3):
            out = out + GAUSS[2 - a][2 - b] * xp[:, :, a:a + h + 2, b:b + w + 2]
    return out.astype(x.dtype)


if __name__ == "__main__":
    key = jax.random.PRNGKey(0)
    # conv_transpose2d weight shape (1,1,3,3) implies a single-channel input.
    x = jax.random.normal(key, (2, 1, 16, 16), dtype=jnp.float32)

    out = jax.block_until_ready(jax.jit(gauss_conv2d)(x))
    ref = _reference(x)

    assert out.shape == (2, 1, 18, 18), out.shape
    assert jnp.allclose(out, ref, atol=1e-5, rtol=1e-5), float(
        jnp.max(jnp.abs(out - ref)))

    print("KERNEL_OK")
</pallas_src>

<mosaic_0001>
module attributes {stable_mosaic.version = 11 : i64} {
  func.func @_gauss_convt_kernel(%arg0: i32, %arg1: memref<2x16x16xf32, #tpu.memory_space<vmem>>, %arg2: memref<2x18x18xf32, #tpu.memory_space<vmem>>, %arg3: memref<2x20x20xf32, #tpu.memory_space<vmem>>) attributes {dimension_semantics = [#tpu.dimension_semantics<parallel>], iteration_bounds = array<i64: 1>, scalar_prefetch = 0 : i64, scratch_operands = 1 : i64, tpu.core_type = #tpu.core_type<tc>, window_params = [{transform_indices = @transform_0, window_bounds = array<i64: 2, 16, 16>}, {transform_indices = @transform_1, window_bounds = array<i64: 2, 18, 18>}]} {
    %cst = arith.constant 0.000000e+00 : f32
    %0 = vector.broadcast %cst : f32 to vector<2x2x20xf32>
    %c0 = arith.constant 0 : index
    %c0_0 = arith.constant 0 : index
    %c0_1 = arith.constant 0 : index
    %1 = vector.load %arg3[%c0, %c0_0, %c0_1] : memref<2x20x20xf32, #tpu.memory_space<vmem>>, vector<2x2x20xf32>
    tpu.vector_store %arg3[%c0, %c0_0, %c0_1], %0 {strides = array<i32>} : memref<2x20x20xf32, #tpu.memory_space<vmem>>, vector<2x2x20xf32>,
    %cst_2 = arith.constant 0.000000e+00 : f32
    %2 = vector.broadcast %cst_2 : f32 to vector<2x2x20xf32>
    %c0_3 = arith.constant 0 : index
    %c18 = arith.constant 18 : index
    %c0_4 = arith.constant 0 : index
    %3 = vector.load %arg3[%c0_3, %c18, %c0_4] : memref<2x20x20xf32, #tpu.memory_space<vmem>>, vector<2x2x20xf32>
    tpu.vector_store %arg3[%c0_3, %c18, %c0_4], %2 {strides = array<i32>} : memref<2x20x20xf32, #tpu.memory_space<vmem>>, vector<2x2x20xf32>,
    %cst_5 = arith.constant 0.000000e+00 : f32
    %4 = vector.broadcast %cst_5 : f32 to vector<2x16x2xf32>
    %c0_6 = arith.constant 0 : index
    %c2 = arith.constant 2 : index
    %c0_7 = arith.constant 0 : index
    %5 = vector.load %arg3[%c0_6, %c2, %c0_7] : memref<2x20x20xf32, #tpu.memory_space<vmem>>, vector<2x16x2xf32>
    tpu.vector_store %arg3[%c0_6, %c2, %c0_7], %4 {strides = array<i32>} : memref<2x20x20xf32, #tpu.memory_space<vmem>>, vector<2x16x2xf32>,
    %cst_8 = arith.constant 0.000000e+00 : f32
    %6 = vector.broadcast %cst_8 : f32 to vector<2x16x2xf32>
    %c0_9 = arith.constant 0 : index
    %c2_10 = arith.constant 2 : index
    %c18_11 = arith.constant 18 : index
    %7 = vector.load %arg3[%c0_9, %c2_10, %c18_11] : memref<2x20x20xf32, #tpu.memory_space<vmem>>, vector<2x16x2xf32>
    tpu.vector_store %arg3[%c0_9, %c2_10, %c18_11], %6 {strides = array<i32>} : memref<2x20x20xf32, #tpu.memory_space<vmem>>, vector<2x16x2xf32>,
    %c0_12 = arith.constant 0 : index
    %c0_13 = arith.constant 0 : index
    %c0_14 = arith.constant 0 : index
    %8 = vector.load %arg1[%c0_12, %c0_13, %c0_14] : memref<2x16x16xf32, #tpu.memory_space<vmem>>, vector<2x16x16xf32>
    %c0_15 = arith.constant 0 : index
    %c2_16 = arith.constant 2 : index
    %c2_17 = arith.constant 2 : index
    %9 = vector.load %arg3[%c0_15, %c2_16, %c2_17] : memref<2x20x20xf32, #tpu.memory_space<vmem>>, vector<2x16x16xf32>
    tpu.vector_store %arg3[%c0_15, %c2_16, %c2_17], %8 {strides = array<i32>} : memref<2x20x20xf32, #tpu.memory_space<vmem>>, vector<2x16x16xf32>,
    %c0_18 = arith.constant 0 : index
    %c0_19 = arith.constant 0 : index
    %c0_20 = arith.constant 0 : index
    %10 = vector.load %arg3[%c0_18, %c0_19, %c0_20] : memref<2x20x20xf32, #tpu.memory_space<vmem>>, vector<2x20x20xf32>
    %11 = vector.extract_strided_slice %10 {offsets = [0, 0, 0], sizes = [2, 18, 20], strides = [1, 1, 1]} : vector<2x20x20xf32> to vector<2x18x20xf32>
    %12 = vector.extract_strided_slice %10 {offsets = [0, 2, 0], sizes = [2, 18, 20], strides = [1, 1, 1]} : vector<2x20x20xf32> to vector<2x18x20xf32>
    %13 = arith.addf %11, %12 : vector<2x18x20xf32>
    %cst_21 = arith.constant 0.194874734 : f32
    %14 = vector.broadcast %cst_21 : f32 to vector<2x18x20xf32>
    %15 = arith.mulf %14, %13 : vector<2x18x20xf32>
    %16 = vector.extract_strided_slice %10 {offsets = [0, 1, 0], sizes = [2, 18, 20], strides = [1, 1, 1]} : vector<2x20x20xf32> to vector<2x18x20xf32>
    %cst_22 = arith.constant 0.230217293 : f32
    %17 = vector.broadcast %cst_22 : f32 to vector<2x18x20xf32>
    %18 = arith.mulf %17, %16 : vector<2x18x20xf32>
    %19 = arith.addf %15, %18 : vector<2x18x20xf32>
    %20 = vector.extract_strided_slice %19 {offsets = [0, 0, 0], sizes = [2, 18, 18], strides = [1, 1, 1]} : vector<2x18x20xf32> to vector<2x18x18xf32>
    %21 = vector.extract_strided_slice %19 {offsets = [0, 0, 2], sizes = [2, 18, 18], strides = [1, 1, 1]} : vector<2x18x20xf32> to vector<2x18x18xf32>
    %22 = arith.addf %20, %21 : vector<2x18x18xf32>
    %cst_23 = arith.constant 0.194874734 : f32
    %23 = vector.broadcast %cst_23 : f32 to vector<2x18x18xf32>
    %24 = arith.mulf %23, %22 : vector<2x18x18xf32>
    %25 = vector.extract_strided_slice %19 {offsets = [0, 0, 1], sizes = [2, 18, 18], strides = [1, 1, 1]} : vector<2x18x20xf32> to vector<2x18x18xf32>
    %cst_24 = arith.constant 0.230217293 : f32
    %26 = vector.broadcast %cst_24 : f32 to vector<2x18x18xf32>
    %27 = arith.mulf %26, %25 : vector<2x18x18xf32>
    %28 = arith.addf %24, %27 : vector<2x18x18xf32>
    %c0_25 = arith.constant 0 : index
    %c0_26 = arith.constant 0 : index
    %c0_27 = arith.constant 0 : index
    %29 = vector.load %arg2[%c0_25, %c0_26, %c0_27] : memref<2x18x18xf32, #tpu.memory_space<vmem>>, vector<2x18x18xf32>
    tpu.vector_store %arg2[%c0_25, %c0_26, %c0_27], %28 {strides = array<i32>} : memref<2x18x18xf32, #tpu.memory_space<vmem>>, vector<2x18x18xf32>,
    return
  }
  func.func @transform_0(%arg0: i32) -> (i32, i32, i32) {
    %c0_i32 = arith.constant 0 : i32
    %c0_i32_0 = arith.constant 0 : i32
    %c0_i32_1 = arith.constant 0 : i32
    return %arg0, %c0_i32, %c0_i32_0 : i32, i32, i32
  }
  func.func @transform_1(%arg0: i32) -> (i32, i32, i32) {
    %c0_i32 = arith.constant 0 : i32
    %c0_i32_0 = arith.constant 0 : i32
    %c0_i32_1 = arith.constant 0 : i32
    return %arg0, %c0_i32, %c0_i32_0 : i32, i32, i32
  }
}

</mosaic_0001>

<bundles_post_ra>
// kernel: gauss_conv2d.1
= control target key start
LH: loop header
LB: loop body
LE: loop exit
PB: predicated region body
PF: predicated region fallthrough
CT: control target
= control target key end

     0   :  { %6 = vsyncpa [#allocation4], 0  ;;  %s254_s6 = smov [#allocation3]   ;;  %s315_s0 = inlined_call_operand.hbm [shape: f32[2,16,16], index: 0, kind: input, shape index: {}]   ;;  %s316_s1 = inlined_call_operand.vmem [shape: f32[2,18,18], index: 1, kind: output, shape index: {}]  }
   0x1   :  { %s12_s7 = sshll.u32 %s254_s6, 4  ;;  %s230_s10 = scalar_lea.hbm %s315_s0, 512  ;;  %s13_s7 = int_to_ptr.vmem [resolvable:$true] %s12_s7 }
   0x2   :  { %p231_p0 = scmp.ne.s32.totalorder %s315_s0, %s230_s10  ;;  %p234_p1 = scmp.lt.u32.totalorder %s230_s10, %s315_s0 }
   0x4   :  { %p236_p2 = pnand %p234_p1, %p231_p0 }
   0x6   :  { %239 = shalt.err (!%p236_p2)
}
   0x7   :  { %s240_s15 = scalar_lea.vmem %s13_s7, 512  ;;  %p245_p4 = scmp.lt.s32.totalorder %s13_s7, %s13_s7 }
   0x8   :  { %p241_p3 = scmp.ne.s32.totalorder %s13_s7, %s240_s15  ;;  %p246_p5 = scmp.lt.s32.totalorder %s240_s15, %s240_s15 }
   0xa   :  { %p247_p6 = por %p246_p5, %p245_p4 }
   0xc   :  { %p248_p7 = pnand %p247_p6, %p241_p3 }
   0xe   :  { %251 = shalt.err (!%p248_p7)
}
   0xf   :  { %s255_s16 = smov 128   ;;  %s256_s17 = smov 8  }
  0x10   :  { %18 = dma.hbm_to_vmem [thread:$0]  %s315_s0, 512, %s13_s7, [#allocation4], %s255_s16, %s255_s16, %s256_s17  }
  0x11   :  { %252 = dma.done.wait [#allocation4], 512  }
  0x12   :  { %253 = vsyncadd [#allocation4], 4294966784  ;;  %vm27_vm0 = vcmask 15360   ;;  %vm32_vm1 = vcmask 162960   ;;  %v257_v0 = vmov 0.0   ;;  %vm22_vm2 = vcmask 156672  }
  0x13   :  { %30 = vst.msk [vmem:[#allocation2 + $0x1a] sm:$0xff] %vm27_vm0, %v257_v0  ;;  %28 = vst.msk [vmem:[#allocation2 + $0x2] sm:$0xff] %vm27_vm0, %v257_v0  ;;  %v39_v1 = vld [vmem:[#allocation3 + $0x10] sm:$0xff]  ;;  %v37_v2 = vld [vmem:[#allocation3] sm:$0xff]  ;;  %s258_s0 = smov 2   ;;  %vm57_vm3 = vcmask 146448  }
  0x14   :  { %29 = vst.msk [vmem:[#allocation2 + $0xa] sm:$0xff] %vm27_vm0, %v257_v0  ;;  %31 = vst.msk [vmem:[#allocation2 + $0x22] sm:$0xff] %vm27_vm0, %v257_v0  ;;  %49 = vrot.lane.b32.xlu1 %v39_v1, %s258_s0  ;;  %45 = vrot.lane.b32.xlu0 %v37_v2, %s258_s0  ;;  %v40_v3 = vld [vmem:[#allocation3 + $0x18] sm:$0xff]  ;;  %v38_v4 = vld [vmem:[#allocation3 + $0x8] sm:$0xff]  ;;  %vm74_vm4 = vcmask 1045504   ;;  %vm115_vm5 = vcmask 1046528  }
  0x15   :  { %35 = vst.msk [vmem:[#allocation2 + $0x1a] sm:$0xff] %vm32_vm1, %v257_v0  ;;  %33 = vst.msk [vmem:[#allocation2 + $0x2] sm:$0xff] %vm32_vm1, %v257_v0  ;;  %s259_s20 = smov 126   ;;  %s260_s21 = smov 127   ;;  %vm210_vm6 = vcmask 146432   ;;  %vm213_vm7 = vcmask 140288  }
  0x16   :  { %34 = vst.msk [vmem:[#allocation2 + $0xa] sm:$0xff] %vm32_vm1, %v257_v0  ;;  %36 = vst.msk [vmem:[#allocation2 + $0x22] sm:$0xff] %vm32_vm1, %v257_v0 }
  0x17   :  { %26 = vst.msk [vmem:[#allocation2 + $0x2a] sm:$0x3] %vm22_vm2, %v257_v0  ;;  %23 = vst.msk [vmem:[#allocation2] sm:$0x3] %vm22_vm2, %v257_v0 }
  0x18   :  { %24 = vst.msk [vmem:[#allocation2 + $0x18] sm:$0x3] %vm22_vm2, %v257_v0  ;;  %25 = vst.msk [vmem:[#allocation2 + $0x12] sm:$0x3] %vm22_vm2, %v257_v0  ;;  %51 = vrot.lane.b32.xlu1 %v40_v3, %s258_s0  ;;  %47 = vrot.lane.b32.xlu0 %v38_v4, %s258_s0 }
  0x86   :  { %v50_v5 = vpop.permute.xlu1 %49  ;;  %v46_v6 = vpop.permute.xlu0 %45 }
  0x87   :  { %60 = vst.msk [vmem:[#allocation2 + $0x1a] sm:$0xff] %vm57_vm3, %v50_v5  ;;  %58 = vst.msk [vmem:[#allocation2 + $0x2] sm:$0xff] %vm57_vm3, %v46_v6 }
  0x8a   :  { %v52_v7 = vpop.permute.xlu1 %51  ;;  %v48_v8 = vpop.permute.xlu0 %47 }
  0x8b   :  { %61 = vst.msk [vmem:[#allocation2 + $0x22] sm:$0xff] %vm57_vm3, %v52_v7  ;;  %59 = vst.msk [vmem:[#allocation2 + $0xa] sm:$0xff] %vm57_vm3, %v48_v8 }
  0x8e   :  { %v62_v9 = vld [vmem:[#allocation2] sm:$0xff]  ;;  %v65_v10 = vld [vmem:[#allocation2 + $0x18] sm:$0xff] }
  0x8f   :  { %v75_v14 = vrot.slane %v62_v9, 2  ;;  %v103_v21 = vmul.f32 0.2302173, %v62_v9  ;;  %v80_v26 = vrot.slane %v65_v10, 2  ;;  %v106_v44 = vmul.f32 0.2302173, %v65_v10 }
  0x91   :  { %v116_v42 = vrot.slane %v103_v21, 1  ;;  %v121_v54 = vrot.slane %v106_v44, 1 }
  0x92   :  { %v67_v11 = vld [vmem:[#allocation2 + $0x28] sm:$0xf]  ;;  %v64_v12 = vld [vmem:[#allocation2 + $0x10] sm:$0xf]  ;;  %v66_v22 = vld [vmem:[#allocation2 + $0x20] sm:$0xff] }
  0x93   :  { %v63_v13 = vld [vmem:[#allocation2 + $0x8] sm:$0xff]  ;;  %v83_v15 = vrot.slane %v67_v11, 2  ;;  %v108_v16 = vmul.f32 0.2302173, %v67_v11  ;;  %v78_v17 = vrot.slane %v64_v12, 2  ;;  %v81_v30 = vrot.slane %v66_v22, 2 }
  0x94   :  { %v105_v18 = vmul.f32 0.2302173, %v64_v12  ;;  %v76_v19 = vrot.slane %v63_v13, 2  ;;  %v104_v20 = vmul.f32 0.2302173, %v63_v13 }
  0x95   :  { %v96_v23 = vadd.f32 %v83_v15, %v67_v11  ;;  %v124_v24 = vrot.slane %v108_v16, 1  ;;  %v93_v25 = vadd.f32 %v78_v17, %v64_v12  ;;  %v82_v36 = vsel %vm74_vm4, %v80_v26, %v81_v30 }
  0x96   :  { %v119_v27 = vrot.slane %v105_v18, 1  ;;  %v79_v28 = vsel %vm74_vm4, %v76_v19, %v78_v17  ;;  %v77_v29 = vsel %vm74_vm4, %v75_v14, %v76_v19  ;;  %v117_v35 = vrot.slane %v104_v20, 1 }
  0x97   :  { %v102_v31 = vmul.f32 0.19487473, %v96_v23  ;;  %v99_v32 = vmul.f32 0.19487473, %v93_v25  ;;  %v92_v33 = vadd.f32 %v79_v28, %v63_v13  ;;  %v91_v34 = vadd.f32 %v77_v29, %v62_v9 }
  0x98   :  { %v107_v37 = vmul.f32 0.2302173, %v66_v22  ;;  %v94_v43 = vadd.f32 %v82_v36, %v65_v10  ;;  %v84_v45 = vsel %vm74_vm4, %v81_v30, %v83_v15  ;;  %v120_v47 = vsel %vm115_vm5, %v117_v35, %v119_v27 }
  0x99   :  { %v137_v38 = vadd.f32 %v124_v24, %v102_v31  ;;  %v134_v39 = vadd.f32 %v119_v27, %v99_v32  ;;  %v98_v40 = vmul.f32 0.19487473, %v92_v33  ;;  %v97_v41 = vmul.f32 0.19487473, %v91_v34 }
  0x9a   :  { %v95_v46 = vadd.f32 %v84_v45, %v66_v22  ;;  %v118_v48 = vsel %vm115_vm5, %v116_v42, %v117_v35  ;;  %v122_v49 = vrot.slane %v107_v37, 1  ;;  %v100_v52 = vmul.f32 0.19487473, %v94_v43 }
  0x9b   :  { %154 = vrot.lane.b32.xlu1 %v137_v38, %s259_s20  ;;  %148 = vrot.lane.b32.xlu0 %v134_v39, %s259_s20  ;;  %v133_v50 = vadd.f32 %v120_v47, %v98_v40  ;;  %v132_v51 = vadd.f32 %v118_v48, %v97_v41  ;;  %v176_v60 = vmul.f32 0.2302173, %v134_v39  ;;  %v179_v63 = vmul.f32 0.2302173, %v137_v38 }
  0x9c   :  { %v101_v53 = vmul.f32 0.19487473, %v95_v46  ;;  %v123_v55 = vsel %vm115_vm5, %v121_v54, %v122_v49  ;;  %v125_v56 = vsel %vm115_vm5, %v122_v49, %v124_v24 }
  0x9d   :  { %v135_v57 = vadd.f32 %v123_v55, %v100_v52  ;;  %v175_v59 = vmul.f32 0.2302173, %v133_v50  ;;  %v174_v62 = vmul.f32 0.2302173, %v132_v51 }
  0x9e   :  { %v136_v58 = vadd.f32 %v125_v56, %v101_v53 }
  0x9f   :  { %146 = vrot.lane.b32.xlu1 %v133_v50, %s259_s20  ;;  %144 = vrot.lane.b32.xlu0 %v132_v51, %s259_s20  ;;  %v177_v61 = vmul.f32 0.2302173, %v135_v57 }
  0xa0   :  { %v178_v0 = vmul.f32 0.2302173, %v136_v58 }
  0xa3   :  { %150 = vrot.lane.b32.xlu1 %v135_v57, %s259_s20  ;;  %152 = vrot.lane.b32.xlu0 %v136_v58, %s259_s20 }
  0xa7   :  { %188 = vrot.lane.b32.xlu1 %v175_v59, %s260_s21  ;;  %190 = vrot.lane.b32.xlu0 %v176_v60, %s260_s21 }
  0xab   :  { %192 = vrot.lane.b32.xlu1 %v177_v61, %s260_s21  ;;  %186 = vrot.lane.b32.xlu0 %v174_v62, %s260_s21 }
  0xaf   :  { %196 = vrot.lane.b32.xlu1 %v179_v63, %s260_s21  ;;  %194 = vrot.lane.b32.xlu0 %v178_v0, %s260_s21 }
 0x10d   :  { %v155_v1 = vpop.permute.xlu1 %154  ;;  %v149_v2 = vpop.permute.xlu0 %148 }
 0x10e   :  { %v164_v5 = vadd.f32 %v149_v2, %v134_v39  ;;  %v167_v17 = vadd.f32 %v155_v1, %v137_v38 }
 0x110   :  { %v170_v9 = vmul.f32 0.19487473, %v164_v5  ;;  %v173_v25 = vmul.f32 0.19487473, %v167_v17 }
 0x111   :  { %v147_v3 = vpop.permute.xlu1 %146  ;;  %v145_v4 = vpop.permute.xlu0 %144 }
 0x112   :  { %v163_v6 = vadd.f32 %v147_v3, %v133_v50  ;;  %v162_v11 = vadd.f32 %v145_v4, %v132_v51 }
 0x114   :  { %v169_v10 = vmul.f32 0.19487473, %v163_v6  ;;  %v168_v18 = vmul.f32 0.19487473, %v162_v11 }
 0x115   :  { %v151_v7 = vpop.permute.xlu1 %150  ;;  %v153_v8 = vpop.permute.xlu0 %152 }
 0x116   :  { %v165_v12 = vadd.f32 %v151_v7, %v135_v57  ;;  %v166_v20 = vadd.f32 %v153_v8, %v136_v58 }
 0x118   :  { %v171_v19 = vmul.f32 0.19487473, %v165_v12  ;;  %v172_v26 = vmul.f32 0.19487473, %v166_v20 }
 0x119   :  { %v189_v13 = vpop.permute.xlu1 %188  ;;  %v191_v14 = vpop.permute.xlu0 %190 }
 0x11a   :  { %v205_v15 = vadd.f32 %v189_v13, %v169_v10  ;;  %v206_v16 = vadd.f32 %v191_v14, %v170_v9 }
 0x11c   :  { %212 = vst.msk [vmem:[%s316_s1 + $0x8] sm:$0xff] %vm210_vm6, %v205_v15 }
 0x11d   :  { %214 = vst.msk [vmem:[%s316_s1 + $0x10] sm:$0x3] %vm213_vm7, %v206_v16  ;;  %v193_v21 = vpop.permute.xlu1 %192  ;;  %v187_v22 = vpop.permute.xlu0 %186 }
 0x11e   :  { %v207_v23 = vadd.f32 %v193_v21, %v171_v19  ;;  %v204_v24 = vadd.f32 %v187_v22, %v168_v18 }
 0x120   :  { %215 = vst.msk [vmem:[%s316_s1 + $0x18] sm:$0xff] %vm210_vm6, %v207_v23  ;;  %211 = vst.msk [vmem:[%s316_s1] sm:$0xff] %vm210_vm6, %v204_v24 }
 0x121   :  { %v197_v27 = vpop.permute.xlu1 %196  ;;  %v195_v28 = vpop.permute.xlu0 %194 }
 0x122   :  { %v209_v29 = vadd.f32 %v197_v27, %v173_v25  ;;  %v208_v30 = vadd.f32 %v195_v28, %v172_v26 }
 0x124   :  { %217 = vst.msk [vmem:[%s316_s1 + $0x28] sm:$0x3] %vm213_vm7, %v209_v29 }
 0x125   :  { %216 = vst.msk [vmem:[%s316_s1 + $0x20] sm:$0xff] %vm210_vm6, %v208_v30 }
 0x126   :  { %222 = vsyncpa [#allocation4], 1 }

</bundles_post_ra>
